<compile_context>
chip_gen: v6e
topology: v6e:2x2x1
jax: 0.10.0
libtpu: 0.0.40
codegen_flags: <defaults>
</compile_context>

<pallas_src>
import functools

import jax
import jax.numpy as jnp
import numpy as np
from jax.experimental import pallas as pl
from jax.experimental.pallas import tpu as pltpu


# ------------------------------------------------------------------ kernel ---

def _vae_kernel(n_enc, n_dec, lat_dim, mlv_off, feat,
                xe_ref, w_ref, b_ref,     # inputs: packed x|spk|eps slab, weight slab, bias slab
                out_ref):                 # output: packed recon | mu|logvar slab
    """Fused VAE forward over one batch tile; weights come as packed slabs."""
    tile_b = xe_ref.shape[0]

    def wblk(i):                          # i-th 128x128-aligned weight block
        return w_ref[pl.ds(i * feat, feat), :]

    def brow(i):                          # i-th bias row (1, feat)
        return b_ref[pl.ds(i, 1), :]

    def linear(h, i):
        return jnp.dot(h, wblk(i), preferred_element_type=jnp.float32) + brow(i)

    xe = xe_ref[...]                      # x | spk_contrib | eps (other lanes zero)

    # ---- encoder: Linear -> ReLU (spk/eps lanes are inert: zero weight rows)
    h = xe
    for l in range(n_enc):
        h = jnp.maximum(linear(h, l), 0.0)

    # ---- fused latent head: mu at lanes [mlv_off:mlv_off+lat),
    #      logvar at [mlv_off+lat:mlv_off+2lat); all other lanes exactly 0.
    lat = linear(h, n_enc)

    # ---- lane-aligned reparameterize + speaker pass-through ----
    lane = jax.lax.broadcasted_iota(jnp.int32, (tile_b, feat), 1)
    is_mu = jnp.logical_and(lane >= mlv_off, lane < mlv_off + lat_dim)
    is_lv = jnp.logical_and(lane >= mlv_off + lat_dim, lane < mlv_off + 2 * lat_dim)
    # mu lanes -> mu ; logvar lanes -> eps*std ; spk lanes -> spk_contrib (exp(0)=1);
    # x lanes pass x but the decoder-0 block has zero rows there (no effect).
    z_dup = jnp.where(is_mu, lat, xe * jnp.exp(0.5 * jnp.where(is_lv, lat, 0.0)))

    # ---- decoder layer 0: single fused matmul (W0z duplicated at mu/lv rows,
    #      identity at spk rows folds the speaker contribution into the MXU) ----
    h = jnp.maximum(linear(z_dup, n_enc + 1), 0.0)

    # ---- remaining decoder layers ----
    for j in range(1, n_dec):
        h = jnp.maximum(linear(h, n_enc + 1 + j), 0.0)

    # ---- output projection (outMu) packed with mu|logvar into one slab ----
    # out-proj lanes >= input_dim are exact zeros; lat lanes < mlv_off are exact
    # zeros -> the add is an exact lane-wise pack.
    out_ref[...] = linear(h, n_enc + n_dec + 1) + lat


# ----------------------------------------------------- one-time param prep ---

def prep_params(p, *, n_enc, n_dec, lat_dim):
    """Pack PyTorch-layout params into two VMEM slabs + a speaker table (host side, once)."""
    input_dim = p["outMu"][0].shape[0]
    spk_cell, y_dim = p["spkEmb"][0].shape
    dec_cell = p["dec"][0][0].shape[0]
    enc_cell = p["enc"][0][0].shape[0] if n_enc else input_dim
    feat = 128
    assert max(input_dim, enc_cell, dec_cell, spk_cell) <= feat
    assert 2 * lat_dim <= feat

    # lane layout shared by the packed input and output slabs
    mlv_off = feat - 2 * lat_dim                 # mu|logvar lanes
    spk_off = ((input_dim + 7) // 8) * 8         # speaker-contribution lanes (input slab)
    assert input_dim <= mlv_off, "recon and mu|logvar lanes must not overlap"
    assert spk_off + dec_cell <= mlv_off, "spk lanes must not overlap mu|logvar/eps lanes"

    n_blocks = n_enc + n_dec + 2                 # enc..., latent head, dec0-fused, dec1.., out
    n_brows = max(8, -(-(n_enc + n_dec + 2) // 8) * 8)
    w_slab = np.zeros((n_blocks * feat, feat), np.float32)
    b_slab = np.zeros((n_brows, feat), np.float32)

    def put_w(blk, mat, row=0, col=0):
        r, c = mat.shape
        w_slab[blk * feat + row: blk * feat + row + r, col: col + c] = mat

    def put_b(i, vec, col=0):
        b_slab[i, col: col + vec.shape[0]] = vec

    for l in range(n_enc):                                   # encoder
        w, b = p["enc"][l]
        put_w(l, np.asarray(w).T)
        put_b(l, np.asarray(b))

    wmu, bmu = p["latMu"]                                    # fused latent head (packed lanes)
    wvar, bvar = p["latVar"]
    put_w(n_enc, np.asarray(wmu).T, col=mlv_off)
    put_w(n_enc, np.asarray(wvar).T, col=mlv_off + lat_dim)
    put_b(n_enc, np.asarray(bmu), col=mlv_off)
    put_b(n_enc, np.asarray(bvar), col=mlv_off + lat_dim)

    w0, b0 = p["dec"][0]                                     # decoder layer 0 (fused block)
    w0 = np.asarray(w0)                                      # (dec_cell, lat+spk)
    w0zT = w0[:, :lat_dim].T                                 # (lat, dec_cell)
    w0s = w0[:, lat_dim:]                                    # (dec_cell, spk_cell)
    blk0 = np.zeros((feat, feat), np.float32)
    blk0[mlv_off: mlv_off + lat_dim, :dec_cell] = w0zT               # mu path
    blk0[mlv_off + lat_dim: mlv_off + 2 * lat_dim, :dec_cell] = w0zT # eps*std path (dup)
    blk0[spk_off: spk_off + dec_cell, :dec_cell] = np.eye(dec_cell, dtype=np.float32)
    put_w(n_enc + 1, blk0)
    put_b(n_enc + 1, np.asarray(b0))

    for j in range(1, n_dec):                                # decoder layers 1..
        w, b = p["dec"][j]
        put_w(n_enc + 1 + j, np.asarray(w).T)
        put_b(n_enc + 1 + j, np.asarray(b))

    wout, bout = p["outMu"]                                  # output projection
    put_w(n_enc + n_dec + 1, np.asarray(wout).T)
    put_b(n_enc + n_dec + 1, np.asarray(bout))

    # per-speaker decoder-0 contribution: (W_spk[:,k] + b_spk) @ W0_spk^T
    wspk, bspk = p["spkEmb"]                                 # (spk_cell, y_dim), (spk_cell,)
    spk_tbl = (np.asarray(wspk).T + np.asarray(bspk)[None, :]) @ w0s.T   # (y_dim, dec_cell)

    return {"w_slab": jnp.asarray(w_slab), "b_slab": jnp.asarray(b_slab),
            "spk_tbl": jnp.asarray(spk_tbl.astype(np.float32)),
            "feat": feat, "input_dim": input_dim, "dec_cell": dec_cell,
            "lat_dim": lat_dim, "mlv_off": mlv_off, "spk_off": spk_off,
            "n_enc": n_enc, "n_dec": n_dec}


# ----------------------------------------------------------------- wrapper ---

def make_vae_forward(packed, *, tile_b):
    """Build a jitted forward fn (x, eps, spk_idx) -> (out, mu, logvar)."""
    w_slab, b_slab, spk_tbl = packed["w_slab"], packed["b_slab"], packed["spk_tbl"]
    feat, lat_dim = packed["feat"], packed["lat_dim"]
    mlv_off, spk_off = packed["mlv_off"], packed["spk_off"]
    n_enc, n_dec = packed["n_enc"], packed["n_dec"]
    input_dim, dec_cell = packed["input_dim"], packed["dec_cell"]
    n_wrows, n_brows = w_slab.shape[0], b_slab.shape[0]

    kernel = functools.partial(_vae_kernel, n_enc, n_dec, lat_dim, mlv_off, feat)

    @jax.jit
    def fwd(x, eps, spk_idx):
        B = x.shape[0]
        assert B % tile_b == 0, "batch must be a multiple of tile_b"

        # speaker gather in the wrapper (tiny table, plain XLA gather)
        spk_contrib = spk_tbl[spk_idx.astype(jnp.int32)]             # (B, dec_cell)

        # ONE packed lane-dense input slab: x | spk_contrib | eps(at logvar lanes)
        xe = (jnp.zeros((B, feat), jnp.float32)
              .at[:, :input_dim].set(x.astype(jnp.float32))
              .at[:, spk_off: spk_off + dec_cell].set(spk_contrib)
              .at[:, mlv_off + lat_dim: mlv_off + 2 * lat_dim].set(eps.astype(jnp.float32)))

        grid_spec = pltpu.PrefetchScalarGridSpec(
            num_scalar_prefetch=0,
            grid=(B // tile_b,),
            in_specs=[
                pl.BlockSpec((tile_b, feat), lambda i: (i, 0)),    # packed input slab
                pl.BlockSpec((n_wrows, feat), lambda i: (0, 0)),   # weight slab (VMEM resident)
                pl.BlockSpec((n_brows, feat), lambda i: (0, 0)),   # bias slab (VMEM resident)
            ],
            out_specs=pl.BlockSpec((tile_b, feat), lambda i: (i, 0)),  # packed output slab
        )
        out_packed = pl.pallas_call(
            kernel,
            out_shape=jax.ShapeDtypeStruct((B, feat), jnp.float32),
            grid_spec=grid_spec,
            # "parallel" lets v7x's two TensorCores split the batch grid
            # (grid length kept >= 2 and even by choosing tile_b = B / (2*k)).
            compiler_params=pltpu.CompilerParams(
                dimension_semantics=("parallel",)),
        )(xe, w_slab, b_slab)

        return (out_packed[:, :input_dim],
                out_packed[:, mlv_off: mlv_off + lat_dim],
                out_packed[:, mlv_off + lat_dim: mlv_off + 2 * lat_dim])

    return fwd


# ------------------------------------------------------- param construction --

def init_params(key, input_dim, enc_cell, n_enc, lat_dim, spk_cell, y_dim,
                dec_cell, n_dec):
    """Deterministic init matching __init__: weight ~ U(0, 1e-5), bias = 0."""
    keys = iter(jax.random.split(key, 64))

    def lin(in_d, out_d):
        w = jax.random.uniform(next(keys), (out_d, in_d), jnp.float32,
                               minval=0.0, maxval=1e-5)
        return (w, jnp.zeros((out_d,), jnp.float32))

    p = {}
    cur = input_dim
    p["enc"] = []
    for _ in range(n_enc):
        p["enc"].append(lin(cur, enc_cell))
        cur = enc_cell
    p["latMu"] = lin(cur, lat_dim)
    p["latVar"] = lin(cur, lat_dim)
    p["spkEmb"] = lin(y_dim, spk_cell)
    cur = spk_cell + lat_dim
    p["dec"] = []
    for _ in range(n_dec):
        p["dec"].append(lin(cur, dec_cell))
        cur = dec_cell
    p["outMu"] = lin(cur, input_dim)
    p["outVar"] = lin(cur, input_dim)   # unused in forward(); kept for parity
    return p


def ref_forward(x, eps, y_onehot, p):
    """Pure-JAX reference of the (intended) PyTorch forward."""
    h = x
    for w, b in p["enc"]:
        h = jnp.maximum(h @ w.T + b, 0.0)
    mu = h @ p["latMu"][0].T + p["latMu"][1]
    logvar = h @ p["latVar"][0].T + p["latVar"][1]
    z = eps * jnp.exp(0.5 * logvar) + mu
    spk_y = y_onehot @ p["spkEmb"][0].T + p["spkEmb"][1]
    h = jnp.concatenate([z, spk_y], axis=1)
    for w, b in p["dec"]:
        h = jnp.maximum(h @ w.T + b, 0.0)
    out = h @ p["outMu"][0].T + p["outMu"][1]
    return out, mu, logvar


# -------------------------------------------------------------------- main ---

if __name__ == "__main__":
    # small config consistent with the module's __init__
    INPUT_DIM, ENC_CELL, ENC_LAYERS = 32, 32, 2
    LAT_DIM, SPK_CELL = 16, 16
    DEC_CELL, DEC_LAYERS = 32, 2
    spk_set = ["spkA", "spkB", "spkC", "spkD"]
    Y_DIM = len(spk_set)
    B, TILE_B = 256, 128          # grid = 2 -> even split across v7x's 2 TCs

    root = jax.random.PRNGKey(0)
    k_param, k_x, k_eps = jax.random.split(root, 3)

    params = init_params(k_param, INPUT_DIM, ENC_CELL, ENC_LAYERS, LAT_DIM,
                         SPK_CELL, Y_DIM, DEC_CELL, DEC_LAYERS)
    packed = prep_params(params, n_enc=ENC_LAYERS, n_dec=DEC_LAYERS,
                         lat_dim=LAT_DIM)
    vae_fwd = make_vae_forward(packed, tile_b=TILE_B)

    x = jax.random.normal(k_x, (B, INPUT_DIM), jnp.float32)
    eps = jax.random.normal(k_eps, (B, LAT_DIM), jnp.float32)   # reparam noise

    # speaker conditioning: spkIds -> indices (kernel uses precomputed table; ref uses one-hot)
    spk_dict = {s: i for i, s in enumerate(spk_set)}
    spk_ids = [spk_set[i % len(spk_set)] for i in range(B)]
    spk_idxs = jnp.asarray(np.array([spk_dict[s] for s in spk_ids], np.int32))

    out, mu, logvar = vae_fwd(x, eps, spk_idxs)
    jax.block_until_ready((out, mu, logvar))

    y_onehot = jnp.asarray(np.eye(Y_DIM, dtype=np.float32)[np.asarray(spk_idxs)])
    out_r, mu_r, logvar_r = ref_forward(x, eps, y_onehot, params)
    np.testing.assert_allclose(np.asarray(out), np.asarray(out_r),
                               rtol=1e-4, atol=1e-7)
    np.testing.assert_allclose(np.asarray(mu), np.asarray(mu_r),
                               rtol=1e-4, atol=1e-7)
    np.testing.assert_allclose(np.asarray(logvar), np.asarray(logvar_r),
                               rtol=1e-4, atol=1e-7)

    print("KERNEL_OK")
</pallas_src>

<mosaic_0001>
module attributes {stable_mosaic.version = 11 : i64} {
  func.func @_vae_kernel(%arg0: i32, %arg1: memref<128x128xf32, #tpu.memory_space<vmem>>, %arg2: memref<768x128xf32, #tpu.memory_space<vmem>>, %arg3: memref<8x128xf32, #tpu.memory_space<vmem>>, %arg4: memref<128x128xf32, #tpu.memory_space<vmem>>) attributes {dimension_semantics = [#tpu.dimension_semantics<parallel>], iteration_bounds = array<i64: 2>, scalar_prefetch = 0 : i64, scratch_operands = 0 : i64, tpu.core_type = #tpu.core_type<tc>, window_params = [{transform_indices = @transform_0, window_bounds = array<i64: 128, 128>}, {pipeline_mode = #tpu.pipeline_mode<synchronous>, transform_indices = @transform_1, window_bounds = array<i64: 768, 128>}, {pipeline_mode = #tpu.pipeline_mode<synchronous>, transform_indices = @transform_2, window_bounds = array<i64: 8, 128>}, {transform_indices = @transform_3, window_bounds = array<i64: 128, 128>}]} {
    %c0 = arith.constant 0 : index
    %c0_0 = arith.constant 0 : index
    %0 = vector.load %arg1[%c0, %c0_0] : memref<128x128xf32, #tpu.memory_space<vmem>>, vector<128x128xf32>
    %c0_1 = arith.constant 0 : index
    %c0_2 = arith.constant 0 : index
    %1 = vector.load %arg2[%c0_1, %c0_2] : memref<768x128xf32, #tpu.memory_space<vmem>>, vector<128x128xf32>
    %cst = arith.constant dense<0.000000e+00> : vector<128x128xf32>
    %2 = tpu.matmul %0, %1, %cst {dimension_numbers = #tpu.dot_dimension_numbers<[1], [0], [0], [1], [0, 0, 1, 1], [], []>} : vector<128x128xf32>, vector<128x128xf32>, vector<128x128xf32> -> vector<128x128xf32>
    %c0_3 = arith.constant 0 : index
    %c0_4 = arith.constant 0 : index
    %3 = vector.load %arg3[%c0_3, %c0_4] : memref<8x128xf32, #tpu.memory_space<vmem>>, vector<1x128xf32>
    %4 = vector.broadcast %3 : vector<1x128xf32> to vector<128x128xf32>
    %5 = arith.addf %2, %4 : vector<128x128xf32>
    %cst_5 = arith.constant 0.000000e+00 : f32
    %6 = vector.broadcast %cst_5 : f32 to vector<128x128xf32>
    %7 = arith.maximumf %5, %6 : vector<128x128xf32>
    %c128 = arith.constant 128 : index
    %c0_6 = arith.constant 0 : index
    %8 = vector.load %arg2[%c128, %c0_6] : memref<768x128xf32, #tpu.memory_space<vmem>>, vector<128x128xf32>
    %cst_7 = arith.constant dense<0.000000e+00> : vector<128x128xf32>
    %9 = tpu.matmul %7, %8, %cst_7 {dimension_numbers = #tpu.dot_dimension_numbers<[1], [0], [0], [1], [0, 0, 1, 1], [], []>} : vector<128x128xf32>, vector<128x128xf32>, vector<128x128xf32> -> vector<128x128xf32>
    %c1 = arith.constant 1 : index
    %c0_8 = arith.constant 0 : index
    %10 = vector.load %arg3[%c1, %c0_8] : memref<8x128xf32, #tpu.memory_space<vmem>>, vector<1x128xf32>
    %11 = vector.broadcast %10 : vector<1x128xf32> to vector<128x128xf32>
    %12 = arith.addf %9, %11 : vector<128x128xf32>
    %cst_9 = arith.constant 0.000000e+00 : f32
    %13 = vector.broadcast %cst_9 : f32 to vector<128x128xf32>
    %14 = arith.maximumf %12, %13 : vector<128x128xf32>
    %c256 = arith.constant 256 : index
    %c0_10 = arith.constant 0 : index
    %15 = vector.load %arg2[%c256, %c0_10] : memref<768x128xf32, #tpu.memory_space<vmem>>, vector<128x128xf32>
    %cst_11 = arith.constant dense<0.000000e+00> : vector<128x128xf32>
    %16 = tpu.matmul %14, %15, %cst_11 {dimension_numbers = #tpu.dot_dimension_numbers<[1], [0], [0], [1], [0, 0, 1, 1], [], []>} : vector<128x128xf32>, vector<128x128xf32>, vector<128x128xf32> -> vector<128x128xf32>
    %c2 = arith.constant 2 : index
    %c0_12 = arith.constant 0 : index
    %17 = vector.load %arg3[%c2, %c0_12] : memref<8x128xf32, #tpu.memory_space<vmem>>, vector<1x128xf32>
    %18 = vector.broadcast %17 : vector<1x128xf32> to vector<128x128xf32>
    %19 = arith.addf %16, %18 : vector<128x128xf32>
    %20 = tpu.iota {dimensions = array<i32: 1>} : vector<128x128xi32>
    %c96_i32 = arith.constant 96 : i32
    %21 = vector.broadcast %c96_i32 : i32 to vector<128x128xi32>
    %22 = arith.cmpi sge, %20, %21 : vector<128x128xi32>
    %c112_i32 = arith.constant 112 : i32
    %23 = vector.broadcast %c112_i32 : i32 to vector<128x128xi32>
    %24 = arith.cmpi slt, %20, %23 : vector<128x128xi32>
    %25 = arith.andi %22, %24 : vector<128x128xi1>
    %c112_i32_13 = arith.constant 112 : i32
    %26 = vector.broadcast %c112_i32_13 : i32 to vector<128x128xi32>
    %27 = arith.cmpi sge, %20, %26 : vector<128x128xi32>
    %c128_i32 = arith.constant 128 : i32
    %28 = vector.broadcast %c128_i32 : i32 to vector<128x128xi32>
    %29 = arith.cmpi slt, %20, %28 : vector<128x128xi32>
    %30 = arith.andi %27, %29 : vector<128x128xi1>
    %cst_14 = arith.constant 0.000000e+00 : f32
    %31 = vector.broadcast %cst_14 : f32 to vector<128x128xf32>
    %32 = arith.select %30, %19, %31 : vector<128x128xi1>, vector<128x128xf32>
    %cst_15 = arith.constant 5.000000e-01 : f32
    %33 = vector.broadcast %cst_15 : f32 to vector<128x128xf32>
    %34 = arith.mulf %33, %32 : vector<128x128xf32>
    %35 = math.exp %34 : vector<128x128xf32>
    %36 = arith.mulf %0, %35 : vector<128x128xf32>
    %37 = arith.select %25, %19, %36 : vector<128x128xi1>, vector<128x128xf32>
    %c384 = arith.constant 384 : index
    %c0_16 = arith.constant 0 : index
    %38 = vector.load %arg2[%c384, %c0_16] : memref<768x128xf32, #tpu.memory_space<vmem>>, vector<128x128xf32>
    %cst_17 = arith.constant dense<0.000000e+00> : vector<128x128xf32>
    %39 = tpu.matmul %37, %38, %cst_17 {dimension_numbers = #tpu.dot_dimension_numbers<[1], [0], [0], [1], [0, 0, 1, 1], [], []>} : vector<128x128xf32>, vector<128x128xf32>, vector<128x128xf32> -> vector<128x128xf32>
    %c3 = arith.constant 3 : index
    %c0_18 = arith.constant 0 : index
    %40 = vector.load %arg3[%c3, %c0_18] : memref<8x128xf32, #tpu.memory_space<vmem>>, vector<1x128xf32>
    %41 = vector.broadcast %40 : vector<1x128xf32> to vector<128x128xf32>
    %42 = arith.addf %39, %41 : vector<128x128xf32>
    %cst_19 = arith.constant 0.000000e+00 : f32
    %43 = vector.broadcast %cst_19 : f32 to vector<128x128xf32>
    %44 = arith.maximumf %42, %43 : vector<128x128xf32>
    %c512 = arith.constant 512 : index
    %c0_20 = arith.constant 0 : index
    %45 = vector.load %arg2[%c512, %c0_20] : memref<768x128xf32, #tpu.memory_space<vmem>>, vector<128x128xf32>
    %cst_21 = arith.constant dense<0.000000e+00> : vector<128x128xf32>
    %46 = tpu.matmul %44, %45, %cst_21 {dimension_numbers = #tpu.dot_dimension_numbers<[1], [0], [0], [1], [0, 0, 1, 1], [], []>} : vector<128x128xf32>, vector<128x128xf32>, vector<128x128xf32> -> vector<128x128xf32>
    %c4 = arith.constant 4 : index
    %c0_22 = arith.constant 0 : index
    %47 = vector.load %arg3[%c4, %c0_22] : memref<8x128xf32, #tpu.memory_space<vmem>>, vector<1x128xf32>
    %48 = vector.broadcast %47 : vector<1x128xf32> to vector<128x128xf32>
    %49 = arith.addf %46, %48 : vector<128x128xf32>
    %cst_23 = arith.constant 0.000000e+00 : f32
    %50 = vector.broadcast %cst_23 : f32 to vector<128x128xf32>
    %51 = arith.maximumf %49, %50 : vector<128x128xf32>
    %c640 = arith.constant 640 : index
    %c0_24 = arith.constant 0 : index
    %52 = vector.load %arg2[%c640, %c0_24] : memref<768x128xf32, #tpu.memory_space<vmem>>, vector<128x128xf32>
    %cst_25 = arith.constant dense<0.000000e+00> : vector<128x128xf32>
    %53 = tpu.matmul %51, %52, %cst_25 {dimension_numbers = #tpu.dot_dimension_numbers<[1], [0], [0], [1], [0, 0, 1, 1], [], []>} : vector<128x128xf32>, vector<128x128xf32>, vector<128x128xf32> -> vector<128x128xf32>
    %c5 = arith.constant 5 : index
    %c0_26 = arith.constant 0 : index
    %54 = vector.load %arg3[%c5, %c0_26] : memref<8x128xf32, #tpu.memory_space<vmem>>, vector<1x128xf32>
    %55 = vector.broadcast %54 : vector<1x128xf32> to vector<128x128xf32>
    %56 = arith.addf %53, %55 : vector<128x128xf32>
    %57 = arith.addf %56, %19 : vector<128x128xf32>
    %c0_27 = arith.constant 0 : index
    %c0_28 = arith.constant 0 : index
    %58 = vector.load %arg4[%c0_27, %c0_28] : memref<128x128xf32, #tpu.memory_space<vmem>>, vector<128x128xf32>
    tpu.vector_store %arg4[%c0_27, %c0_28], %57 {strides = array<i32>} : memref<128x128xf32, #tpu.memory_space<vmem>>, vector<128x128xf32>,
    return
  }
  func.func @transform_0(%arg0: i32) -> (i32, i32) {
    %c0_i32 = arith.constant 0 : i32
    %c0_i32_0 = arith.constant 0 : i32
    return %arg0, %c0_i32 : i32, i32
  }
  func.func @transform_1(%arg0: i32) -> (i32, i32) {
    %c0_i32 = arith.constant 0 : i32
    %c0_i32_0 = arith.constant 0 : i32
    %c0_i32_1 = arith.constant 0 : i32
    return %c0_i32, %c0_i32_0 : i32, i32
  }
  func.func @transform_2(%arg0: i32) -> (i32, i32) {
    %c0_i32 = arith.constant 0 : i32
    %c0_i32_0 = arith.constant 0 : i32
    %c0_i32_1 = arith.constant 0 : i32
    return %c0_i32, %c0_i32_0 : i32, i32
  }
  func.func @transform_3(%arg0: i32) -> (i32, i32) {
    %c0_i32 = arith.constant 0 : i32
    %c0_i32_0 = arith.constant 0 : i32
    return %arg0, %c0_i32 : i32, i32
  }
}

</mosaic_0001>

<bundles_post_ra>
// kernel: fwd.1
= control target key start
LH: loop header
LB: loop body
LE: loop exit
PB: predicated region body
PF: predicated region fallthrough
CT: control target
= control target key end

     0   :  { %s2055_s12 = smov 0   ;;  %s2658_s0 = inlined_call_operand.vmem [shape: f32[256,128], index: 0, kind: input, shape index: {}]   ;;  %s2659_s1 = inlined_call_operand.vmem [shape: f32[768,128], index: 1, kind: input, shape index: {}]   ;;  %s2660_s2 = inlined_call_operand.vmem [shape: f32[8,128], index: 2, kind: input, shape index: {}]   ;;  %s2661_s3 = inlined_call_operand.vmem [shape: f32[256,128], index: 3, kind: output, shape index: {}]  }
   0x1 LB: > { %s1442_s13 = sadd.s32 4294967295, %s2033_s12   ;;  %p1446_p0 = scmp.ge.s32.totalorder %s2033_s12, 1  ;;  %s2033_s12 = sphi %s2055_s12, %s13_s12  }
   0x2   : > { %p138_p1 = scmp.lt.s32.totalorder %s2033_s12, 3 }
   0x4   : > { %p139_p2 = pnand %p1446_p0, %p138_p1 }
   0x5   : > { %s1447_s18 = sshll.u32 (!%p139_p2), %s1442_s13, 4 }
   0x6   : > { %142 = sbr.rel (%p139_p2) target bundleno = 1292 (0x50c), region = 32  ;;  %p163_p3 = scmp.lt.s32.totalorder (!%p139_p2), %s1447_s18, 31 }
   0xb   : > { %v205_v0 = vld [vmem:[%s2659_s1 + $0x78] sm:$0xff]  ;;  %v204_v1 = vld [vmem:[%s2659_s1 + $0x70] sm:$0xff]  ;;  %v203_v2 = vld [vmem:[%s2659_s1 + $0x68] sm:$0xff]  ;;  %s2665_s18 = smov (!%p163_p3, %s1447_s18), 31 }
   0xc   : > { %1651 = vmatprep.subr.mxu0 %v205_v0  ;;  %v202_v3 = vld [vmem:[%s2659_s1 + $0x60] sm:$0xff]  ;;  %s1448_s23 = sshll.u32 %s2665_s18, 3  ;;  %v387_v4 = vld [vmem:[%s2659_s1 + $0xf8] sm:$0xff]  ;;  %v386_v6 = vld [vmem:[%s2659_s1 + $0xf0] sm:$0xff] }
   0xd   : > { %1652 = vmatpush3.msra.mxu0 %v205_v0  ;;  %v201_v5 = vld [vmem:[%s2659_s1 + $0x58] sm:$0xff]  ;;  %s2089_s30 = scalar_lea.vmem %s2658_s0, %s1448_s23  ;;  %1707 = vmatprep.subr.mxu1 %v387_v4  ;;  %v200_v8 = vld [vmem:[%s2659_s1 + $0x50] sm:$0xff]  ;;  %v385_v9 = vld [vmem:[%s2659_s1 + $0xe8] sm:$0xff] }
   0xe   : > { %1653 = vmatprep.subr.mxu0 %v204_v1  ;;  %v2095_v7 = vld [vmem:[%s2089_s30] sm:$0xff]  ;;  %1708 = vmatpush3.msra.mxu1 %v387_v4  ;;  %v199_v10 = vld [vmem:[%s2659_s1 + $0x48] sm:$0xff]  ;;  %v383_v13 = vld [vmem:[%s2659_s1 + $0xd8] sm:$0xff] }
   0xf   : > { %1654 = vmatpush3.msra.mxu0 %v204_v1  ;;  %1683 = vmatprep.mubr.f32.mxu0 %v2095_v7  ;;  %v384_v11 = vld [vmem:[%s2659_s1 + $0xe0] sm:$0xff]  ;;  %v197_v14 = vld [vmem:[%s2659_s1 + $0x38] sm:$0xff]  ;;  %v382_v15 = vld [vmem:[%s2659_s1 + $0xd0] sm:$0xff] }
  0x10   : > { %1655 = vmatprep.subr.mxu0 %v203_v2  ;;  %1709 = vmatprep.subr.mxu1 %v386_v6  ;;  %v198_v12 = vld [vmem:[%s2659_s1 + $0x40] sm:$0xff]  ;;  %v196_v16 = vld [vmem:[%s2659_s1 + $0x30] sm:$0xff]  ;;  %v381_v17 = vld [vmem:[%s2659_s1 + $0xc8] sm:$0xff] }
  0x11   : > { %1656 = vmatpush3.msra.mxu0 %v203_v2  ;;  %1710 = vmatpush3.msra.mxu1 %v386_v6  ;;  %v195_v18 = vld [vmem:[%s2659_s1 + $0x28] sm:$0xff]  ;;  %v380_v19 = vld [vmem:[%s2659_s1 + $0xc0] sm:$0xff]  ;;  %v379_v21 = vld [vmem:[%s2659_s1 + $0xb8] sm:$0xff] }
  0x12   : > { %1657 = vmatprep.subr.mxu0 %v202_v3  ;;  %1711 = vmatprep.subr.mxu1 %v385_v9  ;;  %v194_v20 = vld [vmem:[%s2659_s1 + $0x20] sm:$0xff]  ;;  %v193_v22 = vld [vmem:[%s2659_s1 + $0x18] sm:$0xff]  ;;  %v378_v23 = vld [vmem:[%s2659_s1 + $0xb0] sm:$0xff] }
  0x13   : > { %1658 = vmatpush3.msra.mxu0 %v202_v3  ;;  %1712 = vmatpush3.msra.mxu1 %v385_v9  ;;  %v192_v24 = vld [vmem:[%s2659_s1 + $0x10] sm:$0xff]  ;;  %v377_v25 = vld [vmem:[%s2659_s1 + $0xa8] sm:$0xff]  ;;  %v376_v27 = vld [vmem:[%s2659_s1 + $0xa0] sm:$0xff] }
  0x14   : > { %1659 = vmatprep.subr.mxu0 %v201_v5  ;;  %1713 = vmatprep.subr.mxu1 %v384_v11  ;;  %v191_v26 = vld [vmem:[%s2659_s1 + $0x8] sm:$0xff]  ;;  %v190_v28 = vld [vmem:[%s2659_s1] sm:$0xff]  ;;  %v2165_v30 = vld [vmem:[%s2089_s30 + $0x10] sm:$0xff] }
  0x15   : > { %1660 = vmatpush3.msra.mxu0 %v201_v5  ;;  %1714 = vmatpush3.msra.mxu1 %v384_v11  ;;  %v2162_v29 = vld [vmem:[%s2089_s30 + $0x8] sm:$0xff]  ;;  %v2170_v31 = vld [vmem:[%s2089_s30 + $0x18] sm:$0xff]  ;;  %v2173_v32 = vld [vmem:[%s2089_s30 + $0x20] sm:$0xff] }
  0x16   : > { %1661 = vmatprep.subr.mxu0 %v200_v8  ;;  %1715 = vmatprep.subr.mxu1 %v383_v13  ;;  %v2178_v33 = vld [vmem:[%s2089_s30 + $0x28] sm:$0xff]  ;;  %v2181_v34 = vld [vmem:[%s2089_s30 + $0x30] sm:$0xff]  ;;  %v2186_v35 = vld [vmem:[%s2089_s30 + $0x38] sm:$0xff] }
  0x17   : > { %1662 = vmatpush3.msra.mxu0 %v200_v8  ;;  %1716 = vmatpush3.msra.mxu1 %v383_v13  ;;  %v2189_v36 = vld [vmem:[%s2089_s30 + $0x40] sm:$0xff]  ;;  %v2194_v37 = vld [vmem:[%s2089_s30 + $0x48] sm:$0xff]  ;;  %v2197_v38 = vld [vmem:[%s2089_s30 + $0x50] sm:$0xff] }
  0x18   : > { %1663 = vmatprep.subr.mxu0 %v199_v10  ;;  %1717 = vmatprep.subr.mxu1 %v382_v15  ;;  %v2202_v39 = vld [vmem:[%s2089_s30 + $0x58] sm:$0xff]  ;;  %v2205_v40 = vld [vmem:[%s2089_s30 + $0x60] sm:$0xff]  ;;  %v2210_v41 = vld [vmem:[%s2089_s30 + $0x68] sm:$0xff] }
  0x19   : > { %1664 = vmatpush3.msra.mxu0 %v199_v10  ;;  %1718 = vmatpush3.msra.mxu1 %v382_v15  ;;  %v2213_v42 = vld [vmem:[%s2089_s30 + $0x70] sm:$0xff]  ;;  %v2218_v43 = vld [vmem:[%s2089_s30 + $0x78] sm:$0xff]  ;;  %v373_v46 = vld [vmem:[%s2659_s1 + $0x88] sm:$0xff]  ;;  %s2621_s30 = scalar_lea.vmem %s2661_s3, %s1448_s23 }
  0x1a   : > { %1665 = vmatprep.subr.mxu0 %v198_v12  ;;  %1719 = vmatprep.subr.mxu1 %v381_v17  ;;  %v375_v44 = vld [vmem:[%s2659_s1 + $0x98] sm:$0xff]  ;;  %v374_v45 = vld [vmem:[%s2659_s1 + $0x90] sm:$0xff]  ;;  %v372_v47 = vld [vmem:[%s2659_s1 + $0x80] sm:$0xff] }
  0x1b   : > { %1666 = vmatpush3.msra.mxu0 %v198_v12  ;;  %1720 = vmatpush3.msra.mxu1 %v381_v17  ;;  %v569_v48 = vld [vmem:[%s2659_s1 + $0x178] sm:$0xff]  ;;  %v568_v49 = vld [vmem:[%s2659_s1 + $0x170] sm:$0xff]  ;;  %v567_v50 = vld [vmem:[%s2659_s1 + $0x168] sm:$0xff] }
  0x1c   : > { %1667 = vmatprep.subr.mxu0 %v197_v14  ;;  %1721 = vmatprep.subr.mxu1 %v380_v19  ;;  %v566_v51 = vld [vmem:[%s2659_s1 + $0x160] sm:$0xff]  ;;  %v565_v52 = vld [vmem:[%s2659_s1 + $0x158] sm:$0xff]  ;;  %v564_v53 = vld [vmem:[%s2659_s1 + $0x150] sm:$0xff] }
  0x1d   : > { %1668 = vmatpush3.msra.mxu0 %v197_v14  ;;  %1722 = vmatpush3.msra.mxu1 %v380_v19  ;;  %v563_v54 = vld [vmem:[%s2659_s1 + $0x148] sm:$0xff]  ;;  %v562_v55 = vld [vmem:[%s2659_s1 + $0x140] sm:$0xff]  ;;  %v561_v56 = vld [vmem:[%s2659_s1 + $0x138] sm:$0xff] }
  0x1e   : > { %1669 = vmatprep.subr.mxu0 %v196_v16  ;;  %1723 = vmatprep.subr.mxu1 %v379_v21  ;;  %v560_v57 = vld [vmem:[%s2659_s1 + $0x130] sm:$0xff]  ;;  %v559_v58 = vld [vmem:[%s2659_s1 + $0x128] sm:$0xff]  ;;  %v558_v59 = vld [vmem:[%s2659_s1 + $0x120] sm:$0xff] }
  0x1f   : > { %1670 = vmatpush3.msra.mxu0 %v196_v16  ;;  %1724 = vmatpush3.msra.mxu1 %v379_v21  ;;  %v557_v60 = vld [vmem:[%s2659_s1 + $0x118] sm:$0xff]  ;;  %v1451_v61 = vld [vmem:[%s2660_s2] ss:$0 sm:$0xff] }
  0x20   : > { %1671 = vmatprep.subr.mxu0 %v195_v18  ;;  %1725 = vmatprep.subr.mxu1 %v378_v23 }
  0x21   : > { %1672 = vmatpush3.msra.mxu0 %v195_v18  ;;  %1726 = vmatpush3.msra.mxu1 %v378_v23 }
  0x22   : > { %1673 = vmatprep.subr.mxu0 %v194_v20  ;;  %1727 = vmatprep.subr.mxu1 %v377_v25 }
  0x23   : > { %1674 = vmatpush3.msra.mxu0 %v194_v20  ;;  %1728 = vmatpush3.msra.mxu1 %v377_v25 }
  0x24   : > { %1675 = vmatprep.subr.mxu0 %v193_v22  ;;  %1729 = vmatprep.subr.mxu1 %v376_v27 }
  0x25   : > { %1676 = vmatpush3.msra.mxu0 %v193_v22  ;;  %1730 = vmatpush3.msra.mxu1 %v376_v27 }
  0x26   : > { %1677 = vmatprep.subr.mxu0 %v192_v24  ;;  %1731 = vmatprep.subr.mxu1 %v375_v44 }
  0x27   : > { %1678 = vmatpush3.msra.mxu0 %v192_v24  ;;  %1732 = vmatpush3.msra.mxu1 %v375_v44 }
  0x28   : > { %1679 = vmatprep.subr.mxu0 %v191_v26  ;;  %1733 = vmatprep.subr.mxu1 %v374_v45 }
  0x29   : > { %1680 = vmatpush3.msra.mxu0 %v191_v26  ;;  %1734 = vmatpush3.msra.mxu1 %v374_v45 }
  0x2a   : > { %1681 = vmatprep.subr.mxu0 %v190_v28  ;;  %1735 = vmatprep.subr.mxu1 %v373_v46 }
  0x2b   : > { %1682 = vmatpush3.msra.mxu0 %v190_v28  ;;  %1736 = vmatpush3.msra.mxu1 %v373_v46 }
  0x2c   : > { %1684 = vmatmul.mubr.f32.vlgmr.msra.gmra.mxu0 %v2162_v29  ;;  %1737 = vmatprep.subr.mxu1 %v372_v47 }
  0x2d   : > { %1686 = vmatprep.mubr.f32.mxu0 %v2165_v30  ;;  %1738 = vmatpush3.msra.mxu1 %v372_v47 }
  0x2e   : > { %1763 = vmatprep.subr.mxu0 %v569_v48 }
  0x2f   : > { %1764 = vmatpush3.msra.mxu0 %v569_v48 }
  0x30   : > { %1687 = vmatmul.mubr.f32.gmra.mxu0 %v2170_v31  ;;  %1765 = vmatprep.subr.mxu0 %v568_v49 }
  0x31   : > { %1689 = vmatprep.mubr.f32.mxu0 %v2173_v32  ;;  %1766 = vmatpush3.msra.mxu0 %v568_v49 }
  0x32   : > { %1767 = vmatprep.subr.mxu0 %v567_v50 }
  0x33   : > { %1768 = vmatpush3.msra.mxu0 %v567_v50 }
  0x34   : > { %1690 = vmatmul.mubr.f32.gmra.mxu0 %v2178_v33  ;;  %1769 = vmatprep.subr.mxu0 %v566_v51 }
  0x35   : > { %1692 = vmatprep.mubr.f32.mxu0 %v2181_v34  ;;  %1770 = vmatpush3.msra.mxu0 %v566_v51 }
  0x36   : > { %1771 = vmatprep.subr.mxu0 %v565_v52 }
  0x37   : > { %1772 = vmatpush3.msra.mxu0 %v565_v52 }
  0x38   : > { %1693 = vmatmul.mubr.f32.gmra.mxu0 %v2186_v35  ;;  %1773 = vmatprep.subr.mxu0 %v564_v53 }
  0x39   : > { %1695 = vmatprep.mubr.f32.mxu0 %v2189_v36  ;;  %1774 = vmatpush3.msra.mxu0 %v564_v53 }
  0x3a   : > { %1775 = vmatprep.subr.mxu0 %v563_v54 }
  0x3b   : > { %1776 = vmatpush3.msra.mxu0 %v563_v54 }
  0x3c   : > { %1696 = vmatmul.mubr.f32.gmra.mxu0 %v2194_v37  ;;  %1777 = vmatprep.subr.mxu0 %v562_v55 }
  0x3d   : > { %1698 = vmatprep.mubr.f32.mxu0 %v2197_v38  ;;  %1778 = vmatpush3.msra.mxu0 %v562_v55 }
  0x3e   : > { %1779 = vmatprep.subr.mxu0 %v561_v56 }
  0x3f   : > { %1780 = vmatpush3.msra.mxu0 %v561_v56 }
  0x40   : > { %1699 = vmatmul.mubr.f32.gmra.mxu0 %v2202_v39  ;;  %1781 = vmatprep.subr.mxu0 %v560_v57 }
  0x41   : > { %1701 = vmatprep.mubr.f32.mxu0 %v2205_v40  ;;  %1782 = vmatpush3.msra.mxu0 %v560_v57 }
  0x42   : > { %1783 = vmatprep.subr.mxu0 %v559_v58 }
  0x43   : > { %1784 = vmatpush3.msra.mxu0 %v559_v58 }
  0x44   : > { %1702 = vmatmul.mubr.f32.gmra.mxu0 %v2210_v41  ;;  %1785 = vmatprep.subr.mxu0 %v558_v59 }
  0x45   : > { %1704 = vmatprep.mubr.f32.mxu0 %v2213_v42  ;;  %1786 = vmatpush3.msra.mxu0 %v558_v59 }
  0x46   : > { %1787 = vmatprep.subr.mxu0 %v557_v60 }
  0x47   : > { %1788 = vmatpush3.msra.mxu0 %v557_v60 }
  0x48   : > { %1705 = vmatmul.mubr.f32.gmra.mxu0 %v2218_v43 }
  0xec   : > { %v1685_v62 = vpop.f32.mrf.mxu0 }
  0xed   : > { %v283_v63 = vadd.f32 %v1685_v62, %v1451_v61 }
  0xee   : > { %v277_v0 = vpop.f32.mrf.mxu0 }
  0xef   : > { %v278_v1 = vadd.f32 %v1451_v61, %v277_v0  ;;  %v357_v4 = vmax.f32 %v283_v63, 0.0  ;;  %v556_v63 = vld [vmem:[%s2659_s1 + $0x110] sm:$0xff]  ;;  %v555_v0 = vld [vmem:[%s2659_s1 + $0x108] sm:$0xff] }
  0xf0   : > { %v1688_v2 = vpop.f32.mrf.mxu0  ;;  %1789 = vmatprep.subr.mxu0 %v556_v63 }
  0xf1   : > { %v356_v3 = vmax.f32 %v278_v1, 0.0  ;;  %v293_v5 = vadd.f32 %v1688_v2, %v1451_v61  ;;  %1790 = vmatpush3.msra.mxu0 %v556_v63  ;;  %v839_v1 = vld [vmem:[%s2659_s1 + $0x1f8] sm:$0xff]  ;;  %v838_v2 = vld [vmem:[%s2659_s1 + $0x1f0] sm:$0xff] }
  0xf2   : > { %v287_v6 = vpop.f32.mrf.mxu0  ;;  %1791 = vmatprep.subr.mxu0 %v555_v0  ;;  %1819 = vmatprep.subr.mxu1 %v839_v1 }
  0xf3   : > { %v288_v8 = vadd.f32 %v1451_v61, %v287_v6  ;;  %1739 = vmatprep.mubr.f32.mxu1 %v356_v3  ;;  %v359_v11 = vmax.f32 %v293_v5, 0.0  ;;  %1792 = vmatpush3.msra.mxu0 %v555_v0  ;;  %v837_v3 = vld [vmem:[%s2659_s1 + $0x1e8] sm:$0xff] }
  0xf4   : > { %v1691_v9 = vpop.f32.mrf.mxu0  ;;  %1740 = vmatmul.mubr.f32.vlgmr.msra.gmra.mxu1 %v357_v4  ;;  %v1452_v4 = vld [vmem:[%s2660_s2 + $0x1] ss:$0 sm:$0xff] }
  0xf5   : > { %v358_v10 = vmax.f32 %v288_v8, 0.0  ;;  %v303_v12 = vadd.f32 %v1691_v9, %v1451_v61  ;;  %1820 = vmatpush3.msra.mxu1 %v839_v1 }
  0xf6   : > { %v297_v13 = vpop.f32.mrf.mxu0  ;;  %1821 = vmatprep.subr.mxu1 %v838_v2 }
  0xf7   : > { %v298_v14 = vadd.f32 %v1451_v61, %v297_v13  ;;  %1742 = vmatprep.mubr.f32.mxu1 %v358_v10  ;;  %v361_v17 = vmax.f32 %v303_v12, 0.0  ;;  %1822 = vmatpush3.msra.mxu1 %v838_v2 }
  0xf8   : > { %v1694_v15 = vpop.f32.mrf.mxu0  ;;  %1743 = vmatmul.mubr.f32.gmra.mxu1 %v359_v11  ;;  %1823 = vmatprep.subr.mxu1 %v837_v3 }
  0xf9   : > { %v360_v16 = vmax.f32 %v298_v14, 0.0  ;;  %v313_v18 = vadd.f32 %v1694_v15, %v1451_v61  ;;  %1824 = vmatpush3.msra.mxu1 %v837_v3 }
  0xfa   : > { %v307_v19 = vpop.f32.mrf.mxu0 }
  0xfb   : > { %v308_v20 = vadd.f32 %v1451_v61, %v307_v19  ;;  %1745 = vmatprep.mubr.f32.mxu1 %v360_v16  ;;  %v363_v23 = vmax.f32 %v313_v18, 0.0 }
  0xfc   : > { %v1697_v21 = vpop.f32.mrf.mxu0  ;;  %1746 = vmatmul.mubr.f32.gmra.mxu1 %v361_v17 }
  0xfd   : > { %v362_v22 = vmax.f32 %v308_v20, 0.0  ;;  %v323_v24 = vadd.f32 %v1697_v21, %v1451_v61 }
  0xfe   : > { %v317_v25 = vpop.f32.mrf.mxu0 }
  0xff   : > { %v318_v26 = vadd.f32 %v1451_v61, %v317_v25  ;;  %1748 = vmatprep.mubr.f32.mxu1 %v362_v22  ;;  %v365_v44 = vmax.f32 %v323_v24, 0.0 }
 0x100   : > { %v1700_v27 = vpop.f32.mrf.mxu0  ;;  %1749 = vmatmul.mubr.f32.gmra.mxu1 %v363_v23 }
 0x101   : > { %v364_v28 = vmax.f32 %v318_v26, 0.0  ;;  %v333_v45 = vadd.f32 %v1700_v27, %v1451_v61 }
 0x102   : > { %v327_v46 = vpop.f32.mrf.mxu0 }
 0x103   : > { %v328_v47 = vadd.f32 %v1451_v61, %v327_v46  ;;  %1751 = vmatprep.mubr.f32.mxu1 %v364_v28  ;;  %v367_v50 = vmax.f32 %v333_v45, 0.0 }
 0x104   : > { %v1703_v48 = vpop.f32.mrf.mxu0  ;;  %1752 = vmatmul.mubr.f32.gmra.mxu1 %v365_v44 }
 0x105   : > { %v366_v49 = vmax.f32 %v328_v47, 0.0  ;;  %v343_v51 = vadd.f32 %v1703_v48, %v1451_v61 }
 0x106   : > { %v337_v52 = vpop.f32.mrf.mxu0 }
 0x107   : > { %v338_v53 = vadd.f32 %v1451_v61, %v337_v52  ;;  %1754 = vmatprep.mubr.f32.mxu1 %v366_v49  ;;  %v369_v56 = vmax.f32 %v343_v51, 0.0 }
 0x108   : > { %v1706_v54 = vpop.f32.mrf.mxu0  ;;  %1755 = vmatmul.mubr.f32.gmra.mxu1 %v367_v50 }
 0x109   : > { %v368_v55 = vmax.f32 %v338_v53, 0.0  ;;  %v353_v57 = vadd.f32 %v1706_v54, %v1451_v61 }
 0x10a   : > { %v347_v58 = vpop.f32.mrf.mxu0 }
 0x10b   : > { %v348_v59 = vadd.f32 %v1451_v61, %v347_v58  ;;  %1757 = vmatprep.mubr.f32.mxu1 %v368_v55  ;;  %v371_v62 = vmax.f32 %v353_v57, 0.0  ;;  %v554_v61 = vld [vmem:[%s2659_s1 + $0x100] sm:$0xff] }
 0x10c   : > { %1758 = vmatmul.mubr.f32.gmra.mxu1 %v369_v56  ;;  %1793 = vmatprep.subr.mxu0 %v554_v61 }
 0x10d   : > { %v370_v60 = vmax.f32 %v348_v59, 0.0  ;;  %1794 = vmatpush3.msra.mxu0 %v554_v61 }
 0x10f   : > { %1760 = vmatprep.mubr.f32.mxu1 %v370_v60 }
 0x110   : > { %1761 = vmatmul.mubr.f32.gmra.mxu1 %v371_v62 }
 0x1b4   : > { %v1741_v5 = vpop.f32.mrf.mxu1 }
 0x1b5   : > { %v465_v6 = vadd.f32 %v1741_v5, %v1452_v4 }
 0x1b6   : > { %v459_v8 = vpop.f32.mrf.mxu1 }
 0x1b7   : > { %v460_v9 = vadd.f32 %v1452_v4, %v459_v8  ;;  %v539_v12 = vmax.f32 %v465_v6, 0.0  ;;  %v836_v6 = vld [vmem:[%s2659_s1 + $0x1e0] sm:$0xff]  ;;  %v835_v8 = vld [vmem:[%s2659_s1 + $0x1d8] sm:$0xff] }
 0x1b8   : > { %v1744_v10 = vpop.f32.mrf.mxu1  ;;  %1825 = vmatprep.subr.mxu1 %v836_v6 }
 0x1b9   : > { %v538_v11 = vmax.f32 %v460_v9, 0.0  ;;  %v475_v13 = vadd.f32 %v1744_v10, %v1452_v4  ;;  %1826 = vmatpush3.msra.mxu1 %v836_v6  ;;  %v833_v9 = vld [vmem:[%s2659_s1 + $0x1c8] sm:$0xff]  ;;  %v832_v10 = vld [vmem:[%s2659_s1 + $0x1c0] sm:$0xff] }
 0x1ba   : > { %v469_v14 = vpop.f32.mrf.mxu1  ;;  %1827 = vmatprep.subr.mxu1 %v835_v8 }
 0x1bb   : > { %v470_v15 = vadd.f32 %v1452_v4, %v469_v14  ;;  %1795 = vmatprep.mubr.f32.mxu0 %v538_v11  ;;  %v541_v18 = vmax.f32 %v475_v13, 0.0  ;;  %1828 = vmatpush3.msra.mxu1 %v835_v8  ;;  %v831_v11 = vld [vmem:[%s2659_s1 + $0x1b8] sm:$0xff]  ;;  %v829_v13 = vld [vmem:[%s2659_s1 + $0x1a8] sm:$0xff]  ;;  %v828_v14 = vld [vmem:[%s2659_s1 + $0x1a0] sm:$0xff] }
 0x1bc   : > { %v1747_v16 = vpop.f32.mrf.mxu1  ;;  %1796 = vmatmul.mubr.f32.vlgmr.msra.gmra.mxu0 %v539_v12  ;;  %v830_v12 = vld [vmem:[%s2659_s1 + $0x1b0] sm:$0xff] }
 0x1bd   : > { %v540_v17 = vmax.f32 %v470_v15, 0.0  ;;  %v485_v19 = vadd.f32 %v1747_v16, %v1452_v4  ;;  %v827_v15 = vld [vmem:[%s2659_s1 + $0x198] sm:$0xff]  ;;  %v826_v16 = vld [vmem:[%s2659_s1 + $0x190] sm:$0xff] }
 0x1be   : > { %v479_v20 = vpop.f32.mrf.mxu1 }
 0x1bf   : > { %v480_v21 = vadd.f32 %v1452_v4, %v479_v20  ;;  %1798 = vmatprep.mubr.f32.mxu0 %v540_v17  ;;  %v543_v24 = vmax.f32 %v485_v19, 0.0  ;;  %v825_v17 = vld [vmem:[%s2659_s1 + $0x188] sm:$0xff]  ;;  %v1021_v19 = vld [vmem:[%s2659_s1 + $0x278] sm:$0xff]  ;;  %v1020_v20 = vld [vmem:[%s2659_s1 + $0x270] sm:$0xff] }
 0x1c0   : > { %v1750_v22 = vpop.f32.mrf.mxu1  ;;  %1799 = vmatmul.mubr.f32.gmra.mxu0 %v541_v18  ;;  %v824_v18 = vld [vmem:[%s2659_s1 + $0x180] sm:$0xff]  ;;  %1875 = vmatprep.subr.mxu0 %v1021_v19 }
 0x1c1   : > { %v542_v23 = vmax.f32 %v480_v21, 0.0  ;;  %v495_v25 = vadd.f32 %v1750_v22, %v1452_v4  ;;  %1876 = vmatpush3.msra.mxu0 %v1021_v19  ;;  %v1019_v21 = vld [vmem:[%s2659_s1 + $0x268] sm:$0xff]  ;;  %v1018_v22 = vld [vmem:[%s2659_s1 + $0x260] sm:$0xff] }
 0x1c2   : > { %v489_v26 = vpop.f32.mrf.mxu1  ;;  %1877 = vmatprep.subr.mxu0 %v1020_v20 }
 0x1c3   : > { %v490_v27 = vadd.f32 %v1452_v4, %v489_v26  ;;  %1801 = vmatprep.mubr.f32.mxu0 %v542_v23  ;;  %v545_v45 = vmax.f32 %v495_v25, 0.0  ;;  %1878 = vmatpush3.msra.mxu0 %v1020_v20  ;;  %v1017_v23 = vld [vmem:[%s2659_s1 + $0x258] sm:$0xff]  ;;  %v1015_v25 = vld [vmem:[%s2659_s1 + $0x248] sm:$0xff]  ;;  %v1014_v26 = vld [vmem:[%s2659_s1 + $0x240] sm:$0xff] }
 0x1c4   : > { %v1753_v28 = vpop.f32.mrf.mxu1  ;;  %1802 = vmatmul.mubr.f32.gmra.mxu0 %v543_v24  ;;  %1879 = vmatprep.subr.mxu0 %v1019_v21  ;;  %v1016_v24 = vld [vmem:[%s2659_s1 + $0x250] sm:$0xff] }
 0x1c5   : > { %v544_v44 = vmax.f32 %v490_v27, 0.0  ;;  %v505_v46 = vadd.f32 %v1753_v28, %v1452_v4  ;;  %1880 = vmatpush3.msra.mxu0 %v1019_v21  ;;  %v1013_v27 = vld [vmem:[%s2659_s1 + $0x238] sm:$0xff]  ;;  %v1012_v28 = vld [vmem:[%s2659_s1 + $0x230] sm:$0xff] }
 0x1c6   : > { %v499_v47 = vpop.f32.mrf.mxu1  ;;  %1881 = vmatprep.subr.mxu0 %v1018_v22 }
 0x1c7   : > { %v500_v48 = vadd.f32 %v1452_v4, %v499_v47  ;;  %1804 = vmatprep.mubr.f32.mxu0 %v544_v44  ;;  %v547_v51 = vmax.f32 %v505_v46, 0.0  ;;  %1882 = vmatpush3.msra.mxu0 %v1018_v22  ;;  %v1011_v44 = vld [vmem:[%s2659_s1 + $0x228] sm:$0xff]  ;;  %v1009_v46 = vld [vmem:[%s2659_s1 + $0x218] sm:$0xff]  ;;  %v720_v47 = vlaneseq }
 0x1c8   : > { %v1756_v49 = vpop.f32.mrf.mxu1  ;;  %1805 = vmatmul.mubr.f32.gmra.mxu0 %v545_v45  ;;  %1883 = vmatprep.subr.mxu0 %v1017_v23  ;;  %v1010_v45 = vld [vmem:[%s2659_s1 + $0x220] sm:$0xff] }
 0x1c9   : > { %v546_v50 = vmax.f32 %v500_v48, 0.0  ;;  %v515_v52 = vadd.f32 %v1756_v49, %v1452_v4  ;;  %1884 = vmatpush3.msra.mxu0 %v1017_v23  ;;  %v2374_v48 = vand.u32 127, %v720_v47  ;;  %v2379_v49 = vld [vmem:[%s2660_s2 + $0x2] ss:$0 sm:$0xff] }
 0x1ca   : > { %v509_v53 = vpop.f32.mrf.mxu1  ;;  %1885 = vmatprep.subr.mxu0 %v1016_v24 }
 0x1cb   : > { %v510_v54 = vadd.f32 %v1452_v4, %v509_v53  ;;  %1807 = vmatprep.mubr.f32.mxu0 %v546_v50  ;;  %v549_v57 = vmax.f32 %v515_v52, 0.0  ;;  %1886 = vmatpush3.msra.mxu0 %v1016_v24  ;;  %vm725_vm0 = vcmp.ge.s32.totalorder %v2374_v48, 112  ;;  %vm722_vm1 = vcmp.ge.s32.totalorder %v2374_v48, 96 }
 0x1cc   : > { %v1759_v55 = vpop.f32.mrf.mxu1  ;;  %1808 = vmatmul.mubr.f32.gmra.mxu0 %v547_v51  ;;  %1887 = vmatprep.subr.mxu0 %v1015_v25  ;;  %vm723_vm2 = vcmp.lt.s32.totalorder %v2374_v48, 112 }
 0x1cd   : > { %v548_v56 = vmax.f32 %v510_v54, 0.0  ;;  %v525_v58 = vadd.f32 %v1759_v55, %v1452_v4  ;;  %1888 = vmatpush3.msra.mxu0 %v1015_v25  ;;  %vm2450_vm3 = vmand %vm722_vm1, %vm723_vm2 }
 0x1ce   : > { %v519_v59 = vpop.f32.mrf.mxu1  ;;  %1889 = vmatprep.subr.mxu0 %v1014_v26 }
 0x1cf   : > { %v520_v60 = vadd.f32 %v1452_v4, %v519_v59  ;;  %1810 = vmatprep.mubr.f32.mxu0 %v548_v56  ;;  %v551_v0 = vmax.f32 %v525_v58, 0.0  ;;  %1890 = vmatpush3.msra.mxu0 %v1014_v26 }
 0x1d0   : > { %v1762_v62 = vpop.f32.mrf.mxu1  ;;  %1811 = vmatmul.mubr.f32.gmra.mxu0 %v549_v57  ;;  %1891 = vmatprep.subr.mxu0 %v1013_v27 }
 0x1d1   : > { %v550_v63 = vmax.f32 %v520_v60, 0.0  ;;  %v535_v61 = vadd.f32 %v1762_v62, %v1452_v4  ;;  %1892 = vmatpush3.msra.mxu0 %v1013_v27 }
 0x1d2   : > { %v529_v1 = vpop.f32.mrf.mxu1  ;;  %1893 = vmatprep.subr.mxu0 %v1012_v28 }
 0x1d3   : > { %v530_v2 = vadd.f32 %v1452_v4, %v529_v1  ;;  %1813 = vmatprep.mubr.f32.mxu0 %v550_v63  ;;  %v553_v5 = vmax.f32 %v535_v61, 0.0  ;;  %v834_v4 = vld [vmem:[%s2659_s1 + $0x1d0] sm:$0xff]  ;;  %1894 = vmatpush3.msra.mxu0 %v1012_v28 }
 0x1d4   : > { %1814 = vmatmul.mubr.f32.gmra.mxu0 %v551_v0  ;;  %1829 = vmatprep.subr.mxu1 %v834_v4 }
 0x1d5   : > { %v552_v3 = vmax.f32 %v530_v2, 0.0  ;;  %1830 = vmatpush3.msra.mxu1 %v834_v4  ;;  %1895 = vmatprep.subr.mxu0 %v1011_v44 }
 0x1d6   : > { %1831 = vmatprep.subr.mxu1 %v833_v9  ;;  %1896 = vmatpush3.msra.mxu0 %v1011_v44 }
 0x1d7   : > { %1816 = vmatprep.mubr.f32.mxu0 %v552_v3  ;;  %1832 = vmatpush3.msra.mxu1 %v833_v9 }
 0x1d8   : > { %1817 = vmatmul.mubr.f32.gmra.mxu0 %v553_v5  ;;  %1833 = vmatprep.subr.mxu1 %v832_v10 }
 0x1d9   : > { %1834 = vmatpush3.msra.mxu1 %v832_v10  ;;  %1897 = vmatprep.subr.mxu0 %v1010_v45 }
 0x1da   : > { %1835 = vmatprep.subr.mxu1 %v831_v11  ;;  %1898 = vmatpush3.msra.mxu0 %v1010_v45 }
 0x1db   : > { %1836 = vmatpush3.msra.mxu1 %v831_v11  ;;  %1899 = vmatprep.subr.mxu0 %v1009_v46 }
 0x1dc   : > { %1837 = vmatprep.subr.mxu1 %v830_v12  ;;  %1900 = vmatpush3.msra.mxu0 %v1009_v46 }
 0x1dd   : > { %1838 = vmatpush3.msra.mxu1 %v830_v12 }
 0x1de   : > { %1839 = vmatprep.subr.mxu1 %v829_v13 }
 0x1df   : > { %1840 = vmatpush3.msra.mxu1 %v829_v13 }
 0x1e0   : > { %1841 = vmatprep.subr.mxu1 %v828_v14 }
 0x1e1   : > { %1842 = vmatpush3.msra.mxu1 %v828_v14 }
 0x1e2   : > { %1843 = vmatprep.subr.mxu1 %v827_v15 }
 0x1e3   : > { %1844 = vmatpush3.msra.mxu1 %v827_v15 }
 0x1e4   : > { %1845 = vmatprep.subr.mxu1 %v826_v16 }
 0x1e5   : > { %1846 = vmatpush3.msra.mxu1 %v826_v16 }
 0x1e6   : > { %1847 = vmatprep.subr.mxu1 %v825_v17 }
 0x1e7   : > { %1848 = vmatpush3.msra.mxu1 %v825_v17 }
 0x1e8   : > { %1849 = vmatprep.subr.mxu1 %v824_v18 }
 0x1e9   : > { %1850 = vmatpush3.msra.mxu1 %v824_v18 }
 0x27c   : > { %v1797_v50 = vpop.f32.mrf.mxu0 }
 0x27d   : > { %v2383_v51 = vadd.f32 %v1797_v50, %v2379_v49 }
 0x27e   : > { %v641_v52 = vpop.f32.mrf.mxu0 }
 0x27f   : > { %v729_v53 = vsel %vm725_vm0, %v2383_v51, 0.0  ;;  %v2389_v54 = vadd.f32 %v2379_v49, %v641_v52 }
 0x280   : > { %v745_v55 = vmul.f32 0.5, %v729_v53  ;;  %v1800_v56 = vpop.f32.mrf.mxu0 }
 0x281   : > { %v728_v57 = vsel %vm725_vm0, %v2389_v54, 0.0  ;;  %v2395_v58 = vadd.f32 %v1800_v56, %v2379_v49 }
 0x282   : > { %v762_v59 = vmul.f32 1.442695, %v745_v55  ;;  %v744_v60 = vmul.f32 0.5, %v728_v57  ;;  %v651_v62 = vpop.f32.mrf.mxu0 }
 0x283   : > { %v731_v63 = vsel %vm725_vm0, %v2395_v58, 0.0  ;;  %v2401_v0 = vadd.f32 %v2379_v49, %v651_v62 }
 0x284   : > { %1995 = vpow2.f32 %v762_v59  ;;  %v760_v61 = vmul.f32 1.442695, %v744_v60  ;;  %v747_v1 = vmul.f32 0.5, %v731_v63  ;;  %v1803_v2 = vpop.f32.mrf.mxu0  ;;  %v1203_v63 = vld [vmem:[%s2659_s1 + $0x2f8] sm:$0xff] }
 0x285   : > { %v730_v3 = vsel %vm725_vm0, %v2401_v0, 0.0  ;;  %v2407_v5 = vadd.f32 %v1803_v2, %v2379_v49  ;;  %1931 = vmatprep.subr.mxu1 %v1203_v63 }
 0x286   : > { %1997 = vpow2.f32 %v760_v61  ;;  %v766_v6 = vmul.f32 1.442695, %v747_v1  ;;  %v746_v8 = vmul.f32 0.5, %v730_v3  ;;  %v661_v4 = vpop.f32.mrf.mxu0 }
 0x287   : > { %v733_v9 = vsel %vm725_vm0, %v2407_v5, 0.0  ;;  %v2413_v10 = vadd.f32 %v2379_v49, %v661_v4 }
 0x288   : > { %1999 = vpow2.f32 %v766_v6  ;;  %v764_v11 = vmul.f32 1.442695, %v746_v8  ;;  %v749_v12 = vmul.f32 0.5, %v733_v9  ;;  %v1806_v13 = vpop.f32.mrf.mxu0 }
 0x289   : > { %v732_v14 = vsel %vm725_vm0, %v2413_v10, 0.0  ;;  %v2419_v15 = vadd.f32 %v1806_v13, %v2379_v49 }
 0x28a   : > { %2001 = vpow2.f32 %v764_v11  ;;  %v770_v16 = vmul.f32 1.442695, %v749_v12  ;;  %v748_v17 = vmul.f32 0.5, %v732_v14  ;;  %v671_v18 = vpop.f32.mrf.mxu0 }
 0x28b   : > { %v735_v19 = vsel %vm725_vm0, %v2419_v15, 0.0  ;;  %v2425_v20 = vadd.f32 %v2379_v49, %v671_v18 }
 0x28c   : > { %2003 = vpow2.f32 %v770_v16  ;;  %v768_v21 = vmul.f32 1.442695, %v748_v17  ;;  %v751_v22 = vmul.f32 0.5, %v735_v19  ;;  %v1809_v23 = vpop.f32.mrf.mxu0 }
 0x28d   : > { %v734_v24 = vsel %vm725_vm0, %v2425_v20, 0.0  ;;  %v2431_v25 = vadd.f32 %v1809_v23, %v2379_v49 }
 0x28e   : > { %2005 = vpow2.f32 %v768_v21  ;;  %v774_v26 = vmul.f32 1.442695, %v751_v22  ;;  %v750_v27 = vmul.f32 0.5, %v734_v24  ;;  %v681_v28 = vpop.f32.mrf.mxu0 }
 0x28f   : > { %v737_v44 = vsel %vm725_vm0, %v2431_v25, 0.0  ;;  %v2438_v45 = vadd.f32 %v2379_v49, %v681_v28 }
 0x290   : > { %2007 = vpow2.f32 %v774_v26  ;;  %v772_v46 = vmul.f32 1.442695, %v750_v27  ;;  %v753_v47 = vmul.f32 0.5, %v737_v44  ;;  %v1812_v50 = vpop.f32.mrf.mxu0 }
 0x291   : > { %v1996_v52 = vpop.eup %1995  ;;  %v736_v53 = vsel %vm725_vm0, %v2438_v45, 0.0  ;;  %v2445_v55 = vadd.f32 %v1812_v50, %v2379_v49 }
 0x292   : > { %v793_v56 = vmul.f32 %v1996_v52, %v2162_v29  ;;  %2009 = vpow2.f32 %v772_v46  ;;  %v778_v57 = vmul.f32 1.442695, %v753_v47  ;;  %v752_v59 = vmul.f32 0.5, %v736_v53  ;;  %v691_v60 = vpop.f32.mrf.mxu0 }
 0x293   : > { %v1998_v62 = vpop.eup %1997  ;;  %v739_v61 = vsel %vm725_vm0, %v2445_v55, 0.0  ;;  %v2458_v1 = vadd.f32 %v2379_v49, %v691_v60 }
 0x294   : > { %2011 = vpow2.f32 %v778_v57  ;;  %v776_v29 = vmul.f32 1.442695, %v752_v59  ;;  %v755_v2 = vmul.f32 0.5, %v739_v61  ;;  %v1815_v3 = vpop.f32.mrf.mxu0  ;;  %v792_v9 = vmul.f32 %v1998_v62, %v2095_v7 }
 0x295   : > { %v2000_v6 = vpop.eup %1999  ;;  %v738_v8 = vsel %vm725_vm0, %v2458_v1, 0.0  ;;  %v2464_v4 = vadd.f32 %v1815_v3, %v2379_v49  ;;  %v809_v11 = vsel %vm2450_vm3, %v2383_v51, %v793_v56 }
 0x296   : > { %2013 = vpow2.f32 %v776_v29  ;;  %v782_v12 = vmul.f32 1.442695, %v755_v2  ;;  %v754_v13 = vmul.f32 0.5, %v738_v8  ;;  %v701_v14 = vpop.f32.mrf.mxu0  ;;  %v808_v7 = vsel %vm2450_vm3, %v2389_v54, %v792_v9 }
 0x297   : > { %v2002_v16 = vpop.eup %2001  ;;  %v741_v17 = vsel %vm725_vm0, %v2464_v4, 0.0  ;;  %v2474_v18 = vadd.f32 %v2379_v49, %v701_v14  ;;  %v795_v19 = vmul.f32 %v2000_v6, %v2170_v31  ;;  %1851 = vmatprep.mubr.f32.mxu1 %v808_v7 }
 0x298   : > { %2015 = vpow2.f32 %v782_v12  ;;  %v780_v21 = vmul.f32 1.442695, %v754_v13  ;;  %v757_v22 = vmul.f32 0.5, %v741_v17  ;;  %v1818_v23 = vpop.f32.mrf.mxu0  ;;  %v794_v24 = vmul.f32 %v2002_v16, %v2165_v30  ;;  %1852 = vmatmul.mubr.f32.vlgmr.msra.gmra.mxu1 %v809_v11 }
 0x299   : > { %v2004_v26 = vpop.eup %2003  ;;  %v740_v27 = vsel %vm725_vm0, %v2474_v18, 0.0  ;;  %v2485_v28 = vadd.f32 %v1818_v23, %v2379_v49  ;;  %v811_v53 = vsel %vm2450_vm3, %v2395_v58, %v795_v19  ;;  %1932 = vmatpush3.msra.mxu1 %v1203_v63 }
 0x29a   : > { %2017 = vpow2.f32 %v780_v21  ;;  %v786_v44 = vmul.f32 1.442695, %v757_v22  ;;  %v756_v46 = vmul.f32 0.5, %v740_v27  ;;  %v711_v31 = vpop.f32.mrf.mxu0  ;;  %v810_v47 = vsel %vm2450_vm3, %v2401_v0, %v794_v24 }
 0x29b   : > { %v2006_v50 = vpop.eup %2005  ;;  %v743_v30 = vsel %vm725_vm0, %v2485_v28, 0.0  ;;  %v2494_v52 = vadd.f32 %v2379_v49, %v711_v31  ;;  %1854 = vmatprep.mubr.f32.mxu1 %v810_v47  ;;  %v797_v56 = vmul.f32 %v2004_v26, %v2178_v33  ;;  %v1008_v31 = vld [vmem:[%s2659_s1 + $0x210] sm:$0xff] }
 0x29c   : > { %2019 = vpow2.f32 %v786_v44  ;;  %v784_v57 = vmul.f32 1.442695, %v756_v46  ;;  %v759_v59 = vmul.f32 0.5, %v743_v30  ;;  %v796_v60 = vmul.f32 %v2006_v50, %v2173_v32  ;;  %1855 = vmatmul.mubr.f32.gmra.mxu1 %v811_v53  ;;  %1901 = vmatprep.subr.mxu0 %v1008_v31  ;;  %v1202_v47 = vld [vmem:[%s2659_s1 + $0x2f0] sm:$0xff]  ;;  %v1201_v50 = vld [vmem:[%s2659_s1 + $0x2e8] sm:$0xff]  ;;  %v1200_v30 = vld [vmem:[%s2659_s1 + $0x2e0] sm:$0xff] }
 0x29d   : > { %v2008_v62 = vpop.eup %2007  ;;  %v742_v61 = vsel %vm725_vm0, %v2494_v52, 0.0  ;;  %v813_v33 = vsel %vm2450_vm3, %v2407_v5, %v797_v56  ;;  %1902 = vmatpush3.msra.mxu0 %v1008_v31  ;;  %1933 = vmatprep.subr.mxu1 %v1202_v47  ;;  %v1199_v53 = vld [vmem:[%s2659_s1 + $0x2d8] sm:$0xff]  ;;  %v1198_v56 = vld [vmem:[%s2659_s1 + $0x2d0] sm:$0xff] }
 0x29e   : > { %2021 = vpow2.f32 %v784_v57  ;;  %v790_v49 = vmul.f32 1.442695, %v759_v59  ;;  %v758_v29 = vmul.f32 0.5, %v742_v61  ;;  %v812_v2 = vsel %vm2450_vm3, %v2413_v10, %v796_v60  ;;  %1934 = vmatpush3.msra.mxu1 %v1202_v47  ;;  %v1197_v57 = vld [vmem:[%s2659_s1 + $0x2c8] sm:$0xff]  ;;  %v1196_v59 = vld [vmem:[%s2659_s1 + $0x2c0] sm:$0xff]  ;;  %v1195_v60 = vld [vmem:[%s2659_s1 + $0x2b8] sm:$0xff] }
 0x29f   : > { %v2010_v3 = vpop.eup %2009  ;;  %1857 = vmatprep.mubr.f32.mxu1 %v812_v2  ;;  %v799_v48 = vmul.f32 %v2008_v62, %v2186_v35  ;;  %1935 = vmatprep.subr.mxu1 %v1201_v50  ;;  %v1194_v62 = vld [vmem:[%s2659_s1 + $0x2b0] sm:$0xff]  ;;  %v1193_v61 = vld [vmem:[%s2659_s1 + $0x2a8] sm:$0xff]  ;;  %v1454_v2 = vld [vmem:[%s2660_s2 + $0x3] ss:$0 sm:$0xff] }
 0x2a0   : > { %2023 = vpow2.f32 %v790_v49  ;;  %v788_v32 = vmul.f32 1.442695, %v758_v29  ;;  %v798_v6 = vmul.f32 %v2010_v3, %v2181_v34  ;;  %1858 = vmatmul.mubr.f32.gmra.mxu1 %v813_v33  ;;  %v1192_v49 = vld [vmem:[%s2659_s1 + $0x2a0] sm:$0xff]  ;;  %v1191_v29 = vld [vmem:[%s2659_s1 + $0x298] sm:$0xff] }
 0x2a1   : > { %v2012_v8 = vpop.eup %2011  ;;  %v815_v12 = vsel %vm2450_vm3, %v2419_v15, %v799_v48  ;;  %1936 = vmatpush3.msra.mxu1 %v1201_v50 }
 0x2a2   : > { %2025 = vpow2.f32 %v788_v32  ;;  %v814_v9 = vsel %vm2450_vm3, %v2425_v20, %v798_v6  ;;  %v801_v14 = vmul.f32 %v2012_v8, %v2194_v37  ;;  %1937 = vmatprep.subr.mxu1 %v1200_v30 }
 0x2a3   : > { %v2014_v11 = vpop.eup %2013  ;;  %1860 = vmatprep.mubr.f32.mxu1 %v814_v9  ;;  %1938 = vmatpush3.msra.mxu1 %v1200_v30 }
 0x2a4   : > { %v800_v13 = vmul.f32 %v2014_v11, %v2189_v36  ;;  %1861 = vmatmul.mubr.f32.gmra.mxu1 %v815_v12  ;;  %v817_v17 = vsel %vm2450_vm3, %v2431_v25, %v801_v14  ;;  %1939 = vmatprep.subr.mxu1 %v1199_v53 }
 0x2a5   : > { %v2016_v34 = vpop.eup %2015  ;;  %1940 = vmatpush3.msra.mxu1 %v1199_v53 }
 0x2a6   : > { %v816_v35 = vsel %vm2450_vm3, %v2438_v45, %v800_v13  ;;  %v803_v19 = vmul.f32 %v2016_v34, %v2202_v39  ;;  %1941 = vmatprep.subr.mxu1 %v1198_v56 }
 0x2a7   : > { %v2018_v16 = vpop.eup %2017  ;;  %1863 = vmatprep.mubr.f32.mxu1 %v816_v35  ;;  %1942 = vmatpush3.msra.mxu1 %v1198_v56 }
 0x2a8   : > { %v802_v7 = vmul.f32 %v2018_v16, %v2197_v38  ;;  %1864 = vmatmul.mubr.f32.gmra.mxu1 %v817_v17  ;;  %v819_v22 = vsel %vm2450_vm3, %v2445_v55, %v803_v19  ;;  %1943 = vmatprep.subr.mxu1 %v1197_v57 }
 0x2a9   : > { %v2020_v21 = vpop.eup %2019  ;;  %1944 = vmatpush3.msra.mxu1 %v1197_v57 }
 0x2aa   : > { %v818_v36 = vsel %vm2450_vm3, %v2458_v1, %v802_v7  ;;  %v805_v24 = vmul.f32 %v2020_v21, %v2210_v41  ;;  %1945 = vmatprep.subr.mxu1 %v1196_v59 }
 0x2ab   : > { %v2022_v37 = vpop.eup %2021  ;;  %1866 = vmatprep.mubr.f32.mxu1 %v818_v36  ;;  %1946 = vmatpush3.msra.mxu1 %v1196_v59 }
 0x2ac   : > { %v804_v23 = vmul.f32 %v2022_v37, %v2205_v40  ;;  %1867 = vmatmul.mubr.f32.gmra.mxu1 %v819_v22  ;;  %v821_v27 = vsel %vm2450_vm3, %v2464_v4, %v805_v24  ;;  %1947 = vmatprep.subr.mxu1 %v1195_v60 }
 0x2ad   : > { %v2024_v26 = vpop.eup %2023  ;;  %1948 = vmatpush3.msra.mxu1 %v1195_v60 }
 0x2ae   : > { %v820_v38 = vsel %vm2450_vm3, %v2474_v18, %v804_v23  ;;  %v807_v46 = vmul.f32 %v2024_v26, %v2218_v43  ;;  %v1006_v43 = vld [vmem:[%s2659_s1 + $0x200] sm:$0xff]  ;;  %1949 = vmatprep.subr.mxu1 %v1194_v62 }
 0x2af   : > { %v2026_v39 = vpop.eup %2025  ;;  %1869 = vmatprep.mubr.f32.mxu1 %v820_v38  ;;  %1950 = vmatpush3.msra.mxu1 %v1194_v62 }
 0x2b0   : > { %v806_v44 = vmul.f32 %v2026_v39, %v2213_v42  ;;  %1870 = vmatmul.mubr.f32.gmra.mxu1 %v821_v27  ;;  %v823_v41 = vsel %vm2450_vm3, %v2485_v28, %v807_v46  ;;  %v1007_v42 = vld [vmem:[%s2659_s1 + $0x208] sm:$0xff]  ;;  %1951 = vmatprep.subr.mxu1 %v1193_v61 }
 0x2b1   : > { %1903 = vmatprep.subr.mxu0 %v1007_v42  ;;  %1952 = vmatpush3.msra.mxu1 %v1193_v61 }
 0x2b2   : > { %v822_v40 = vsel %vm2450_vm3, %v2494_v52, %v806_v44  ;;  %1904 = vmatpush3.msra.mxu0 %v1007_v42  ;;  %1953 = vmatprep.subr.mxu1 %v1192_v49 }
 0x2b3   : > { %1872 = vmatprep.mubr.f32.mxu1 %v822_v40  ;;  %1905 = vmatprep.subr.mxu0 %v1006_v43 }
 0x2b4   : > { %1873 = vmatmul.mubr.f32.gmra.mxu1 %v823_v41  ;;  %1906 = vmatpush3.msra.mxu0 %v1006_v43 }
 0x2b5   : > { %1954 = vmatpush3.msra.mxu1 %v1192_v49 }
 0x2b6   : > { %1955 = vmatprep.subr.mxu1 %v1191_v29 }
 0x2b7   : > { %1956 = vmatpush3.msra.mxu1 %v1191_v29 }
 0x358   : > { %v1853_v3 = vpop.f32.mrf.mxu1 }
 0x359   : > { %v917_v33 = vadd.f32 %v1853_v3, %v1454_v2 }
 0x35a   : > { %v911_v32 = vpop.f32.mrf.mxu1 }
 0x35b   : > { %v912_v6 = vadd.f32 %v1454_v2, %v911_v32  ;;  %v991_v9 = vmax.f32 %v917_v33, 0.0  ;;  %v1190_v33 = vld [vmem:[%s2659_s1 + $0x290] sm:$0xff]  ;;  %v1189_v32 = vld [vmem:[%s2659_s1 + $0x288] sm:$0xff] }
 0x35c   : > { %v1856_v48 = vpop.f32.mrf.mxu1  ;;  %1957 = vmatprep.subr.mxu1 %v1190_v33 }
 0x35d   : > { %v990_v8 = vmax.f32 %v912_v6, 0.0  ;;  %v927_v11 = vadd.f32 %v1856_v48, %v1454_v2  ;;  %1958 = vmatpush3.msra.mxu1 %v1190_v33  ;;  %v1455_v6 = vld [vmem:[%s2660_s2 + $0x4] ss:$0 sm:$0xff] }
 0x35e   : > { %v921_v12 = vpop.f32.mrf.mxu1  ;;  %1959 = vmatprep.subr.mxu1 %v1189_v32 }
 0x35f   : > { %v922_v13 = vadd.f32 %v1454_v2, %v921_v12  ;;  %1907 = vmatprep.mubr.f32.mxu0 %v990_v8  ;;  %v993_v35 = vmax.f32 %v927_v11, 0.0  ;;  %1960 = vmatpush3.msra.mxu1 %v1189_v32 }
 0x360   : > { %v1859_v14 = vpop.f32.mrf.mxu1  ;;  %1908 = vmatmul.mubr.f32.vlgmr.msra.gmra.mxu0 %v991_v9 }
 0x361   : > { %v992_v34 = vmax.f32 %v922_v13, 0.0  ;;  %v937_v16 = vadd.f32 %v1859_v14, %v1454_v2 }
 0x362   : > { %v931_v17 = vpop.f32.mrf.mxu1 }
 0x363   : > { %v932_v7 = vadd.f32 %v1454_v2, %v931_v17  ;;  %1910 = vmatprep.mubr.f32.mxu0 %v992_v34  ;;  %v995_v36 = vmax.f32 %v937_v16, 0.0 }
 0x364   : > { %v1862_v19 = vpop.f32.mrf.mxu1  ;;  %1911 = vmatmul.mubr.f32.gmra.mxu0 %v993_v35 }
 0x365   : > { %v994_v21 = vmax.f32 %v932_v7, 0.0  ;;  %v947_v37 = vadd.f32 %v1862_v19, %v1454_v2 }
 0x366   : > { %v941_v22 = vpop.f32.mrf.mxu1 }
 0x367   : > { %v942_v23 = vadd.f32 %v1454_v2, %v941_v22  ;;  %1913 = vmatprep.mubr.f32.mxu0 %v994_v21  ;;  %v997_v38 = vmax.f32 %v947_v37, 0.0 }
 0x368   : > { %v1865_v24 = vpop.f32.mrf.mxu1  ;;  %1914 = vmatmul.mubr.f32.gmra.mxu0 %v995_v36 }
 0x369   : > { %v996_v26 = vmax.f32 %v942_v23, 0.0  ;;  %v957_v39 = vadd.f32 %v1865_v24, %v1454_v2 }
 0x36a   : > { %v951_v27 = vpop.f32.mrf.mxu1 }
 0x36b   : > { %v952_v44 = vadd.f32 %v1454_v2, %v951_v27  ;;  %1916 = vmatprep.mubr.f32.mxu0 %v996_v26  ;;  %v999_v41 = vmax.f32 %v957_v39, 0.0 }
 0x36c   : > { %v1868_v46 = vpop.f32.mrf.mxu1  ;;  %1917 = vmatmul.mubr.f32.gmra.mxu0 %v997_v38 }
 0x36d   : > { %v998_v40 = vmax.f32 %v952_v44, 0.0  ;;  %v967_v31 = vadd.f32 %v1868_v46, %v1454_v2 }
 0x36e   : > { %v961_v42 = vpop.f32.mrf.mxu1 }
 0x36f   : > { %v962_v43 = vadd.f32 %v1454_v2, %v961_v42  ;;  %1919 = vmatprep.mubr.f32.mxu0 %v998_v40  ;;  %v1001_v50 = vmax.f32 %v967_v31, 0.0 }
 0x370   : > { %v1871_v63 = vpop.f32.mrf.mxu1  ;;  %1920 = vmatmul.mubr.f32.gmra.mxu0 %v999_v41 }
 0x371   : > { %v1000_v47 = vmax.f32 %v962_v43, 0.0  ;;  %v977_v30 = vadd.f32 %v1871_v63, %v1454_v2 }
 0x372   : > { %v971_v53 = vpop.f32.mrf.mxu1 }
 0x373   : > { %v972_v56 = vadd.f32 %v1454_v2, %v971_v53  ;;  %1922 = vmatprep.mubr.f32.mxu0 %v1000_v47  ;;  %v1003_v60 = vmax.f32 %v977_v30, 0.0 }
 0x374   : > { %v1874_v57 = vpop.f32.mrf.mxu1  ;;  %1923 = vmatmul.mubr.f32.gmra.mxu0 %v1001_v50 }
 0x375   : > { %v1002_v59 = vmax.f32 %v972_v56, 0.0  ;;  %v987_v62 = vadd.f32 %v1874_v57, %v1454_v2 }
 0x376   : > { %v981_v61 = vpop.f32.mrf.mxu1 }
 0x377   : > { %v982_v49 = vadd.f32 %v1454_v2, %v981_v61  ;;  %1925 = vmatprep.mubr.f32.mxu0 %v1002_v59  ;;  %v1005_v3 = vmax.f32 %v987_v62, 0.0  ;;  %v1188_v2 = vld [vmem:[%s2659_s1 + $0x280] sm:$0xff] }
 0x378   : > { %1926 = vmatmul.mubr.f32.gmra.mxu0 %v1003_v60  ;;  %1961 = vmatprep.subr.mxu1 %v1188_v2 }
 0x379   : > { %v1004_v29 = vmax.f32 %v982_v49, 0.0  ;;  %1962 = vmatpush3.msra.mxu1 %v1188_v2 }
 0x37b   : > { %1928 = vmatprep.mubr.f32.mxu0 %v1004_v29 }
 0x37c   : > { %1929 = vmatmul.mubr.f32.gmra.mxu0 %v1005_v3 }
 0x420   : > { %v1909_v48 = vpop.f32.mrf.mxu0 }
 0x421   : > { %v1099_v8 = vadd.f32 %v1909_v48, %v1455_v6 }
 0x422   : > { %v1093_v9 = vpop.f32.mrf.mxu0 }
 0x423   : > { %v1094_v11 = vadd.f32 %v1455_v6, %v1093_v9  ;;  %v1173_v14 = vmax.f32 %v1099_v8, 0.0  ;;  %v1456_v8 = vld [vmem:[%s2660_s2 + $0x5] ss:$0 sm:$0xff] }
 0x424   : > { %v1912_v12 = vpop.f32.mrf.mxu0 }
 0x425   : > { %v1172_v13 = vmax.f32 %v1094_v11, 0.0  ;;  %v1109_v34 = vadd.f32 %v1912_v12, %v1455_v6 }
 0x426   : > { %v1103_v35 = vpop.f32.mrf.mxu0 }
 0x427   : > { %v1104_v16 = vadd.f32 %v1455_v6, %v1103_v35  ;;  %1963 = vmatprep.mubr.f32.mxu1 %v1172_v13  ;;  %v1175_v19 = vmax.f32 %v1109_v34, 0.0 }
 0x428   : > { %v1915_v17 = vpop.f32.mrf.mxu0  ;;  %1964 = vmatmul.mubr.f32.vlgmr.msra.gmra.mxu1 %v1173_v14 }
 0x429   : > { %v1174_v7 = vmax.f32 %v1104_v16, 0.0  ;;  %v1119_v21 = vadd.f32 %v1915_v17, %v1455_v6 }
 0x42a   : > { %v1113_v36 = vpop.f32.mrf.mxu0 }
 0x42b   : > { %v1114_v37 = vadd.f32 %v1455_v6, %v1113_v36  ;;  %1966 = vmatprep.mubr.f32.mxu1 %v1174_v7  ;;  %v1177_v24 = vmax.f32 %v1119_v21, 0.0 }
 0x42c   : > { %v1918_v22 = vpop.f32.mrf.mxu0  ;;  %1967 = vmatmul.mubr.f32.gmra.mxu1 %v1175_v19 }
 0x42d   : > { %v1176_v23 = vmax.f32 %v1114_v37, 0.0  ;;  %v1129_v26 = vadd.f32 %v1918_v22, %v1455_v6 }
 0x42e   : > { %v1123_v38 = vpop.f32.mrf.mxu0 }
 0x42f   : > { %v1124_v39 = vadd.f32 %v1455_v6, %v1123_v38  ;;  %1969 = vmatprep.mubr.f32.mxu1 %v1176_v23  ;;  %v1179_v46 = vmax.f32 %v1129_v26, 0.0 }
 0x430   : > { %v1921_v27 = vpop.f32.mrf.mxu0  ;;  %1970 = vmatmul.mubr.f32.gmra.mxu1 %v1177_v24 }
 0x431   : > { %v1178_v44 = vmax.f32 %v1124_v39, 0.0  ;;  %v1139_v40 = vadd.f32 %v1921_v27, %v1455_v6 }
 0x432   : > { %v1133_v41 = vpop.f32.mrf.mxu0 }
 0x433   : > { %v1134_v31 = vadd.f32 %v1455_v6, %v1133_v41  ;;  %1972 = vmatprep.mubr.f32.mxu1 %v1178_v44  ;;  %v1181_v63 = vmax.f32 %v1139_v40, 0.0 }
 0x434   : > { %v1924_v42 = vpop.f32.mrf.mxu0  ;;  %1973 = vmatmul.mubr.f32.gmra.mxu1 %v1179_v46 }
 0x435   : > { %v1180_v43 = vmax.f32 %v1134_v31, 0.0  ;;  %v1149_v47 = vadd.f32 %v1924_v42, %v1455_v6 }
 0x436   : > { %v1143_v50 = vpop.f32.mrf.mxu0 }
 0x437   : > { %v1144_v30 = vadd.f32 %v1455_v6, %v1143_v50  ;;  %1975 = vmatprep.mubr.f32.mxu1 %v1180_v43  ;;  %v1183_v57 = vmax.f32 %v1149_v47, 0.0 }
 0x438   : > { %v1927_v53 = vpop.f32.mrf.mxu0  ;;  %1976 = vmatmul.mubr.f32.gmra.mxu1 %v1181_v63 }
 0x439   : > { %v1182_v56 = vmax.f32 %v1144_v30, 0.0  ;;  %v1159_v59 = vadd.f32 %v1927_v53, %v1455_v6 }
 0x43a   : > { %v1153_v60 = vpop.f32.mrf.mxu0 }
 0x43b   : > { %v1154_v62 = vadd.f32 %v1455_v6, %v1153_v60  ;;  %1978 = vmatprep.mubr.f32.mxu1 %v1182_v56  ;;  %v1185_v29 = vmax.f32 %v1159_v59, 0.0 }
 0x43c   : > { %v1930_v61 = vpop.f32.mrf.mxu0  ;;  %1979 = vmatmul.mubr.f32.gmra.mxu1 %v1183_v57 }
 0x43d   : > { %v1184_v49 = vmax.f32 %v1154_v62, 0.0  ;;  %v1169_v3 = vadd.f32 %v1930_v61, %v1455_v6 }
 0x43e   : > { %v1163_v33 = vpop.f32.mrf.mxu0 }
 0x43f   : > { %v1164_v32 = vadd.f32 %v1455_v6, %v1163_v33  ;;  %1981 = vmatprep.mubr.f32.mxu1 %v1184_v49  ;;  %v1187_v48 = vmax.f32 %v1169_v3, 0.0 }
 0x440   : > { %1982 = vmatmul.mubr.f32.gmra.mxu1 %v1185_v29 }
 0x441   : > { %v1186_v2 = vmax.f32 %v1164_v32, 0.0 }
 0x443   : > { %1984 = vmatprep.mubr.f32.mxu1 %v1186_v2 }
 0x444   : > { %1985 = vmatmul.mubr.f32.gmra.mxu1 %v1187_v48 }
 0x4e8   : > { %v1965_v9 = vpop.f32.mrf.mxu1 }
 0x4e9   : > { %v1281_v11 = vadd.f32 %v1965_v9, %v1456_v8 }
 0x4ea   : > { %v1275_v6 = vpop.f32.mrf.mxu1 }
 0x4eb   : > { %v1355_v12 = vadd.f32 %v1281_v11, %v2383_v51  ;;  %v1276_v13 = vadd.f32 %v1456_v8, %v1275_v6 }
 0x4ec   : > { %v1968_v14 = vpop.f32.mrf.mxu1 }
 0x4ed   : > { %1371 = vst [vmem:[%s2621_s30 + $0x8] sm:$0xff] %v1355_v12  ;;  %v1354_v34 = vadd.f32 %v1276_v13, %v2389_v54  ;;  %v1291_v35 = vadd.f32 %v1968_v14, %v1456_v8 }
 0x4ee   : > { %v1285_v16 = vpop.f32.mrf.mxu1 }
 0x4ef   : > { %1370 = vst [vmem:[%s2621_s30] sm:$0xff] %v1354_v34  ;;  %v1357_v17 = vadd.f32 %v1291_v35, %v2395_v58  ;;  %v1286_v7 = vadd.f32 %v1456_v8, %v1285_v16 }
 0x4f0   : > { %v1971_v19 = vpop.f32.mrf.mxu1 }
 0x4f1   : > { %1373 = vst [vmem:[%s2621_s30 + $0x18] sm:$0xff] %v1357_v17  ;;  %v1356_v21 = vadd.f32 %v1286_v7, %v2401_v0  ;;  %v1301_v36 = vadd.f32 %v1971_v19, %v1456_v8 }
 0x4f2   : > { %v1295_v51 = vpop.f32.mrf.mxu1 }
 0x4f3   : > { %1372 = vst [vmem:[%s2621_s30 + $0x10] sm:$0xff] %v1356_v21  ;;  %v1359_v37 = vadd.f32 %v1301_v36, %v2407_v5  ;;  %v1296_v22 = vadd.f32 %v1456_v8, %v1295_v51 }
 0x4f4   : > { %v1974_v54 = vpop.f32.mrf.mxu1 }
 0x4f5   : > { %1375 = vst [vmem:[%s2621_s30 + $0x28] sm:$0xff] %v1359_v37  ;;  %v1358_v23 = vadd.f32 %v1296_v22, %v2413_v10  ;;  %v1311_v24 = vadd.f32 %v1974_v54, %v1456_v8 }
 0x4f6   : > { %v1305_v58 = vpop.f32.mrf.mxu1 }
 0x4f7   : > { %1374 = vst [vmem:[%s2621_s30 + $0x20] sm:$0xff] %v1358_v23  ;;  %v1361_v26 = vadd.f32 %v1311_v24, %v2419_v15  ;;  %v1306_v38 = vadd.f32 %v1456_v8, %v1305_v58 }
 0x4f8   : > { %v1977_v0 = vpop.f32.mrf.mxu1 }
 0x4f9   : > { %1377 = vst [vmem:[%s2621_s30 + $0x38] sm:$0xff] %v1361_v26  ;;  %v1360_v39 = vadd.f32 %v1306_v38, %v2425_v20  ;;  %v1321_v27 = vadd.f32 %v1977_v0, %v1456_v8 }
 0x4fa   : > { %v1315_v5 = vpop.f32.mrf.mxu1 }
 0x4fb   : > { %1376 = vst [vmem:[%s2621_s30 + $0x30] sm:$0xff] %v1360_v39  ;;  %v1363_v44 = vadd.f32 %v1321_v27, %v2431_v25  ;;  %v1316_v46 = vadd.f32 %v1456_v8, %v1315_v5 }
 0x4fc   : > { %v1980_v10 = vpop.f32.mrf.mxu1 }
 0x4fd   : > { %1379 = vst [vmem:[%s2621_s30 + $0x48] sm:$0xff] %v1363_v44  ;;  %v1362_v40 = vadd.f32 %v1316_v46, %v2438_v45  ;;  %v1331_v41 = vadd.f32 %v1980_v10, %v1456_v8 }
 0x4fe   : > { %v1325_v15 = vpop.f32.mrf.mxu1 }
 0x4ff   : > { %1378 = vst [vmem:[%s2621_s30 + $0x40] sm:$0xff] %v1362_v40  ;;  %v1365_v31 = vadd.f32 %v1331_v41, %v2445_v55  ;;  %v1326_v42 = vadd.f32 %v1456_v8, %v1325_v15 }
 0x500   : > { %v1983_v20 = vpop.f32.mrf.mxu1 }
 0x501   : > { %1381 = vst [vmem:[%s2621_s30 + $0x58] sm:$0xff] %v1365_v31  ;;  %v1364_v43 = vadd.f32 %v1326_v42, %v2458_v1  ;;  %v1341_v25 = vadd.f32 %v1983_v20, %v1456_v8 }
 0x502   : > { %v1335_v63 = vpop.f32.mrf.mxu1 }
 0x503   : > { %1380 = vst [vmem:[%s2621_s30 + $0x50] sm:$0xff] %v1364_v43  ;;  %v1367_v47 = vadd.f32 %v1341_v25, %v2464_v4  ;;  %v1336_v50 = vadd.f32 %v1456_v8, %v1335_v63 }
 0x504   : > { %v1986_v45 = vpop.f32.mrf.mxu1 }
 0x505   : > { %1383 = vst [vmem:[%s2621_s30 + $0x68] sm:$0xff] %v1367_v47  ;;  %v1366_v30 = vadd.f32 %v1336_v50, %v2474_v18  ;;  %v1351_v53 = vadd.f32 %v1986_v45, %v1456_v8 }
 0x506   : > { %v1345_v56 = vpop.f32.mrf.mxu1 }
 0x507   : > { %1382 = vst [vmem:[%s2621_s30 + $0x60] sm:$0xff] %v1366_v30  ;;  %v1369_v55 = vadd.f32 %v1351_v53, %v2485_v28  ;;  %v1346_v57 = vadd.f32 %v1456_v8, %v1345_v56 }
 0x509   : > { %1385 = vst [vmem:[%s2621_s30 + $0x78] sm:$0xff] %v1369_v55  ;;  %v1368_v1 = vadd.f32 %v1346_v57, %v2494_v52 }
 0x50b   : > { %1384 = vst [vmem:[%s2621_s30 + $0x70] sm:$0xff] %v1368_v1 }
 0x50c PF: > { %s13_s12 = sadd.s32 1, %s2033_s12  }
 0x50d   : > { %p10_p4 = scmp.ge.s32.totalorder %s13_s12, 4  }
 0x50f   :  { %12 = sbr.rel (!%p10_p4) target bundleno = 1 (0x1), region = 62 }

</bundles_post_ra>
